<compile_context>
chip_gen: v7x
topology: tpu7x:2x2x1
jax: 0.10.0
libtpu: 0.0.40
codegen_flags: <defaults>
</compile_context>

<pallas_src>
from functools import partial

import jax
import jax.numpy as jnp
from jax.experimental import pallas as pl
from jax.experimental.pallas import tpu as pltpu


def _tpu_vmem_capacity():
    """Per-core VMEM capacity in bytes (conservative fallback if unavailable)."""
    try:
        get_info = getattr(pltpu, "get_tpu_info", None)
        if get_info is not None:
            cap = getattr(get_info(), "vmem_capacity_bytes", None)
            if cap:
                return int(cap)
    except Exception:
        pass
    return 64 * 1024 * 1024          # v7x per-TC figure = safe lower bound


# --------------------------------------------------------------------------
# Fused single-pass kernel: pool + k-tap channel conv + sigmoid + scale.
# --------------------------------------------------------------------------
def _fused_kernel(w_ref, x_ref, o_ref, ppad_ref, *, k_size, s_total, base):
    pad = (k_size - 1) // 2
    xb = x_ref[...]                                               # (1, C, S)
    c = xb.shape[1]

    # Global average pool, f32, C kept on sublanes (no relayout).
    pooled = jnp.sum(xb, axis=2, keepdims=True, dtype=jnp.float32) * (1.0 / s_total)

    # Zero-padded pooled vector in a tiny VMEM scratch; the k shifted channel
    # windows are plain static sublane slices of it (store is 8-aligned).
    ppad_ref[...] = jnp.zeros_like(ppad_ref)
    ppad_ref[:, base:base + c, :] = pooled
    y = w_ref[0] * ppad_ref[:, base - pad:base - pad + c, :]
    for j in range(1, k_size):
        off = base - pad + j
        y = y + w_ref[j] * ppad_ref[:, off:off + c, :]
    gate = jax.nn.sigmoid(y)                                      # (1, C, 1) f32

    # NOTE: for sub-f32 inputs the gate is rounded to the input dtype before
    # the multiply (one extra rounding vs an all-f32 product); exact for f32.
    o_ref[...] = (xb * gate.astype(xb.dtype)).astype(o_ref.dtype)


# --------------------------------------------------------------------------
# Two-pass path, pass 1: per-(batch, outer-chunk) partial spatial sums (f32).
# --------------------------------------------------------------------------
def _pool_kernel(x_ref, psum_ref, *, s_total, block_s):
    i = pl.program_id(2)

    @pl.when(i == 0)
    def _():
        psum_ref[...] = jnp.zeros_like(psum_ref)

    def _accum(xb):
        # keepdims keeps C on sublanes -> plain VALU adds, no XLU relayout.
        psum_ref[...] += jnp.sum(xb, axis=2, keepdims=True, dtype=jnp.float32)

    tail_len = s_total % block_s
    if tail_len == 0:
        _accum(x_ref[...])                          # unmasked fast path
    else:
        # Only the single global tail block pays for the iota/compare/select.
        is_tail = jnp.logical_and(pl.program_id(1) == pl.num_programs(1) - 1,
                                  i == pl.num_programs(2) - 1)

        @pl.when(jnp.logical_not(is_tail))
        def _():
            _accum(x_ref[...])

        @pl.when(is_tail)
        def _():
            xb = x_ref[...]
            lane = jax.lax.broadcasted_iota(jnp.int32, xb.shape, 2)
            _accum(jnp.where(lane < tail_len, xb, jnp.zeros((), xb.dtype)))


# --------------------------------------------------------------------------
# Two-pass path, pass 2: pure broadcast-multiply stream.
# --------------------------------------------------------------------------
def _scale_kernel(gate_ref, x_ref, o_ref):
    xb = x_ref[...]                                               # (1, C, block_s)
    # NOTE: gate rounded to the input dtype for sub-f32 inputs; exact for f32.
    o_ref[...] = (xb * gate_ref[...].astype(xb.dtype)).astype(o_ref.dtype)


# --------------------------------------------------------------------------
# Wrapper.
# --------------------------------------------------------------------------
def eca_layer(x, conv_w, k_size=3, block_s=None, force_two_pass=False):
    """ECA forward. x: (B, C, H, W) NCHW; conv_w: (1, 1, k) Conv1d weight (no bias)."""
    B, C, H, W = x.shape
    S = H * W
    pad = (k_size - 1) // 2
    itemsize = jnp.dtype(x.dtype).itemsize

    # Generation-aware budgets (v7x: 64 MiB VMEM/TC; v5e/v6e: 128 MiB).
    cap = _tpu_vmem_capacity()
    vmem_limit = int(min(cap * 3 // 4, 64 * 1024 * 1024))

    x3 = x.reshape(B, C, S)                          # free: NCHW is contiguous in H*W
    w = conv_w.reshape(-1).astype(jnp.float32)       # (k,)

    per_batch = C * S * itemsize
    use_fused = (not force_two_pass) and (4 * per_batch + (1 << 20) <= vmem_limit)

    if use_fused:
        # ---------------- fused single-pass path ----------------
        base = ((pad + 7) // 8) * 8                  # 8-aligned scratch offset >= pad
        out3 = pl.pallas_call(
            partial(_fused_kernel, k_size=k_size, s_total=S, base=base),
            out_shape=jax.ShapeDtypeStruct((B, C, S), x.dtype),
            grid=(B,),
            in_specs=[
                pl.BlockSpec(memory_space=pltpu.MemorySpace.SMEM),      # conv weights (k,)
                pl.BlockSpec((1, C, S), lambda b: (b, 0, 0)),           # whole slab per batch
            ],
            out_specs=pl.BlockSpec((1, C, S), lambda b: (b, 0, 0)),
            scratch_shapes=[pltpu.VMEM((1, C + 2 * base, 1), jnp.float32)],
            compiler_params=pltpu.CompilerParams(
                dimension_semantics=("parallel",),
                vmem_limit_bytes=vmem_limit),
            cost_estimate=pl.CostEstimate(
                flops=3 * B * C * S + 2 * B * C * k_size,
                transcendentals=B * C,
                bytes_accessed=2 * B * C * S * itemsize),
        )(w, x3)
        return out3.reshape(B, C, H, W)

    # ---------------- two-pass path ----------------
    # Lane-dense spatial block sized so pass 2 (~2 in + 2 out tiles) fits the limit.
    if block_s is None:
        tile_cap = max(1, (vmem_limit - (2 << 20)) // 6)
        max_s = max(128, (tile_cap // max(1, C * itemsize)) // 128 * 128)
        blk = S if S <= max_s else int(max_s)
    else:
        blk = int(block_s)
    n_s = pl.cdiv(S, blk)
    # If the 128-wide floor forced a bigger tile than planned, raise the limit.
    vmem_limit = int(min(max(vmem_limit, 6 * C * blk * itemsize + (2 << 20)),
                         cap * 7 // 8))

    # Extra "parallel" outer split of the spatial blocks so a v7x megacore has
    # work on the pool pass even at B=1.
    n_outer = 2 if (n_s % 2 == 0 and n_s > 1) else 1
    n_inner = n_s // n_outer

    # ---- pass 1: partial per-channel sums, f32, C kept on sublanes ----
    partials = pl.pallas_call(
        partial(_pool_kernel, s_total=S, block_s=blk),
        out_shape=jax.ShapeDtypeStruct((B * n_outer, C, 1), jnp.float32),
        grid=(B, n_outer, n_inner),
        in_specs=[pl.BlockSpec((1, C, blk),
                               lambda b, o, i: (b, 0, o * n_inner + i))],
        out_specs=pl.BlockSpec((1, C, 1),
                               lambda b, o, i: (b * n_outer + o, 0, 0)),
        compiler_params=pltpu.CompilerParams(
            dimension_semantics=("parallel", "parallel", "arbitrary"),
            vmem_limit_bytes=vmem_limit),
        cost_estimate=pl.CostEstimate(
            flops=B * C * S, transcendentals=0,
            bytes_accessed=B * C * S * itemsize + B * n_outer * C * 4),
    )(x3)

    # ---- tiny (B, C) gate math in the wrapper (negligible vs the x streams) ----
    pooled = partials.reshape(B, n_outer, C).sum(axis=1) * (1.0 / S)      # (B, C) f32
    padded = jnp.pad(pooled, ((0, 0), (pad, pad)))
    y = w[0] * padded[:, 0:C]
    for j in range(1, k_size):
        y = y + w[j] * padded[:, j:j + C]
    gate = jax.nn.sigmoid(y)[:, :, None]                                  # (B, C, 1) f32

    # ---- pass 2: broadcast-multiply stream ----
    # The trailing spatial block may be partial: its out-of-range lanes are read
    # unmasked, multiplied, and their writes discarded by Pallas partial-block
    # semantics (numerics unaffected; the pool pass does mask its tail).
    out3 = pl.pallas_call(
        _scale_kernel,
        out_shape=jax.ShapeDtypeStruct((B, C, S), x.dtype),
        grid=(B, n_s),
        in_specs=[pl.BlockSpec((1, C, 1), lambda b, s: (b, 0, 0)),        # finished gate
                  pl.BlockSpec((1, C, blk), lambda b, s: (b, 0, s))],     # x tile
        out_specs=pl.BlockSpec((1, C, blk), lambda b, s: (b, 0, s)),
        compiler_params=pltpu.CompilerParams(
            dimension_semantics=("parallel", "parallel"),
            vmem_limit_bytes=vmem_limit),
        cost_estimate=pl.CostEstimate(
            flops=B * C * S, transcendentals=0,
            bytes_accessed=2 * B * C * S * itemsize + B * C * 4),
    )(gate, x3)

    return out3.reshape(B, C, H, W)


def eca_ref(x, conv_w, k_size=3):
    """Pure-JAX reference mirroring the PyTorch forward."""
    B, C, H, W = x.shape
    pad = (k_size - 1) // 2
    w = conv_w.reshape(-1).astype(jnp.float32)
    pooled = jnp.mean(x.astype(jnp.float32), axis=(2, 3))                 # (B, C)
    padded = jnp.pad(pooled, ((0, 0), (pad, pad)))
    y = sum(w[j] * padded[:, j:j + C] for j in range(k_size))             # (B, C)
    y = jax.nn.sigmoid(y)
    return (x.astype(jnp.float32) * y[:, :, None, None]).astype(x.dtype)


if __name__ == "__main__":
    key = jax.random.PRNGKey(0)
    kx1, kx2, kx3, kw = jax.random.split(key, 4)

    k_size = 3
    conv_w = jax.random.normal(kw, (1, 1, k_size), dtype=jnp.float32) * 0.5

    eca = jax.jit(eca_layer, static_argnames=("k_size", "block_s", "force_two_pass"))

    # Case 1: small tensor -> fused single-pass path (pool + conv + sigmoid + scale
    # in one kernel; x read from HBM once).
    x1 = jax.random.normal(kx1, (2, 4, 16, 16), dtype=jnp.float32)
    out1 = jax.block_until_ready(eca(x1, conv_w, k_size=k_size))
    ref1 = eca_ref(x1, conv_w, k_size=k_size)
    assert out1.shape == x1.shape and out1.dtype == x1.dtype
    assert jnp.allclose(out1, ref1, atol=1e-5, rtol=1e-5), "mismatch (fused path)"

    # Case 2: forced two-pass path, even block count (outer 'parallel' split for
    # megacore) + masked partial tail block.  S = 144 -> two 128-wide blocks.
    x2 = jax.random.normal(kx2, (2, 4, 12, 12), dtype=jnp.float32)
    out2 = jax.block_until_ready(
        eca(x2, conv_w, k_size=k_size, block_s=128, force_two_pass=True))
    ref2 = eca_ref(x2, conv_w, k_size=k_size)
    assert jnp.allclose(out2, ref2, atol=1e-5, rtol=1e-5), "mismatch (two-pass, even)"

    # Case 3: forced two-pass path, odd block count (no outer split), multi-step
    # f32 accumulation + tail mask, batch of 1.  S = 300 -> three 128-wide blocks.
    x3 = jax.random.normal(kx3, (1, 8, 15, 20), dtype=jnp.float32)
    out3 = jax.block_until_ready(
        eca(x3, conv_w, k_size=k_size, block_s=128, force_two_pass=True))
    ref3 = eca_ref(x3, conv_w, k_size=k_size)
    assert jnp.allclose(out3, ref3, atol=1e-5, rtol=1e-5), "mismatch (two-pass, odd)"

    print("KERNEL_OK")
</pallas_src>

<mosaic_0001>
module attributes {stable_mosaic.version = 11 : i64} {
  func.func @_fused_kernel(%arg0: i32, %arg1: memref<3xf32, #tpu.memory_space<smem>>, %arg2: memref<1x4x256xf32, #tpu.memory_space<vmem>>, %arg3: memref<1x4x256xf32, #tpu.memory_space<vmem>>, %arg4: memref<1x20x1xf32, #tpu.memory_space<vmem>>) attributes {dimension_semantics = [#tpu.dimension_semantics<parallel>], iteration_bounds = array<i64: 2>, scalar_prefetch = 0 : i64, scratch_operands = 1 : i64, tpu.core_type = #tpu.core_type<tc>, window_params = [{transform_indices = @transform_0, window_bounds = array<i64: 3>}, {transform_indices = @transform_1, window_bounds = array<i64: 1, 4, 256>}, {transform_indices = @transform_2, window_bounds = array<i64: 1, 4, 256>}]} {
    %c0 = arith.constant 0 : index
    %c0_0 = arith.constant 0 : index
    %c0_1 = arith.constant 0 : index
    %0 = vector.load %arg2[%c0, %c0_0, %c0_1] : memref<1x4x256xf32, #tpu.memory_space<vmem>>, vector<1x4x256xf32>
    %cst = arith.constant dense<0.000000e+00> : vector<1x4xf32>
    %1 = vector.multi_reduction <add>, %0, %cst [2] : vector<1x4x256xf32> to vector<1x4xf32>
    %2 = vector.shape_cast %1 : vector<1x4xf32> to vector<1x4x1xf32>
    %cst_2 = arith.constant 3.906250e-03 : f32
    %3 = vector.broadcast %cst_2 : f32 to vector<1x4x1xf32>
    %4 = arith.mulf %2, %3 : vector<1x4x1xf32>
    %cst_3 = arith.constant 0.000000e+00 : f32
    %5 = vector.broadcast %cst_3 : f32 to vector<1x20x1xf32>
    %c0_4 = arith.constant 0 : index
    %c0_5 = arith.constant 0 : index
    %c0_6 = arith.constant 0 : index
    %6 = vector.load %arg4[%c0_4, %c0_5, %c0_6] : memref<1x20x1xf32, #tpu.memory_space<vmem>>, vector<1x20x1xf32>
    tpu.vector_store %arg4[%c0_4, %c0_5, %c0_6], %5 {strides = array<i32>} : memref<1x20x1xf32, #tpu.memory_space<vmem>>, vector<1x20x1xf32>,
    %c0_7 = arith.constant 0 : index
    %c8 = arith.constant 8 : index
    %c0_8 = arith.constant 0 : index
    %7 = vector.load %arg4[%c0_7, %c8, %c0_8] : memref<1x20x1xf32, #tpu.memory_space<vmem>>, vector<1x4x1xf32>
    tpu.vector_store %arg4[%c0_7, %c8, %c0_8], %4 {strides = array<i32>} : memref<1x20x1xf32, #tpu.memory_space<vmem>>, vector<1x4x1xf32>,
    %c0_9 = arith.constant 0 : index
    %8 = memref.load %arg1[%c0_9] : memref<3xf32, #tpu.memory_space<smem>>
    %c0_10 = arith.constant 0 : index
    %c7 = arith.constant 7 : index
    %c0_11 = arith.constant 0 : index
    %9 = vector.load %arg4[%c0_10, %c7, %c0_11] : memref<1x20x1xf32, #tpu.memory_space<vmem>>, vector<1x4x1xf32>
    %10 = vector.broadcast %8 : f32 to vector<1x4x1xf32>
    %11 = arith.mulf %10, %9 : vector<1x4x1xf32>
    %c1 = arith.constant 1 : index
    %12 = memref.load %arg1[%c1] : memref<3xf32, #tpu.memory_space<smem>>
    %c0_12 = arith.constant 0 : index
    %c8_13 = arith.constant 8 : index
    %c0_14 = arith.constant 0 : index
    %13 = vector.load %arg4[%c0_12, %c8_13, %c0_14] : memref<1x20x1xf32, #tpu.memory_space<vmem>>, vector<1x4x1xf32>
    %14 = vector.broadcast %12 : f32 to vector<1x4x1xf32>
    %15 = arith.mulf %14, %13 : vector<1x4x1xf32>
    %16 = arith.addf %11, %15 : vector<1x4x1xf32>
    %c2 = arith.constant 2 : index
    %17 = memref.load %arg1[%c2] : memref<3xf32, #tpu.memory_space<smem>>
    %c0_15 = arith.constant 0 : index
    %c9 = arith.constant 9 : index
    %c0_16 = arith.constant 0 : index
    %18 = vector.load %arg4[%c0_15, %c9, %c0_16] : memref<1x20x1xf32, #tpu.memory_space<vmem>>, vector<1x4x1xf32>
    %19 = vector.broadcast %17 : f32 to vector<1x4x1xf32>
    %20 = arith.mulf %19, %18 : vector<1x4x1xf32>
    %21 = arith.addf %16, %20 : vector<1x4x1xf32>
    %22 = arith.negf %21 : vector<1x4x1xf32>
    %23 = math.exp %22 : vector<1x4x1xf32>
    %cst_17 = arith.constant 1.000000e+00 : f32
    %24 = vector.broadcast %cst_17 : f32 to vector<1x4x1xf32>
    %25 = arith.addf %24, %23 : vector<1x4x1xf32>
    %26 = arith.divf %24, %25 : vector<1x4x1xf32>
    %27 = vector.broadcast %26 : vector<1x4x1xf32> to vector<1x4x256xf32>
    %28 = arith.mulf %0, %27 : vector<1x4x256xf32>
    %c0_18 = arith.constant 0 : index
    %c0_19 = arith.constant 0 : index
    %c0_20 = arith.constant 0 : index
    %29 = vector.load %arg3[%c0_18, %c0_19, %c0_20] : memref<1x4x256xf32, #tpu.memory_space<vmem>>, vector<1x4x256xf32>
    tpu.vector_store %arg3[%c0_18, %c0_19, %c0_20], %28 {strides = array<i32>} : memref<1x4x256xf32, #tpu.memory_space<vmem>>, vector<1x4x256xf32>,
    return
  }
  func.func @transform_0(%arg0: i32) -> i32 {
    %c0_i32 = arith.constant 0 : i32
    %c0_i32_0 = arith.constant 0 : i32
    return %c0_i32 : i32
  }
  func.func @transform_1(%arg0: i32) -> (i32, i32, i32) {
    %c0_i32 = arith.constant 0 : i32
    %c0_i32_0 = arith.constant 0 : i32
    %c0_i32_1 = arith.constant 0 : i32
    return %arg0, %c0_i32, %c0_i32_0 : i32, i32, i32
  }
  func.func @transform_2(%arg0: i32) -> (i32, i32, i32) {
    %c0_i32 = arith.constant 0 : i32
    %c0_i32_0 = arith.constant 0 : i32
    %c0_i32_1 = arith.constant 0 : i32
    return %arg0, %c0_i32, %c0_i32_0 : i32, i32, i32
  }
}

</mosaic_0001>

<bundles_post_ra>
// kernel: eca_layer.1
= control target key start
LH: loop header
LB: loop body
LE: loop exit
PB: predicated region body
PF: predicated region fallthrough
CT: control target
= control target key end

     0   :  { %7 = vsyncpa [#allocation4], 0  ;;  %s368_s9 = smov 0   ;;  %s415_s0 = inlined_call_operand.vmem [shape: f32[3], index: 0, kind: input, shape index: {}]   ;;  %s416_s1 = inlined_call_operand.vmem [shape: f32[2,4,256], index: 1, kind: input, shape index: {}]   ;;  %s417_s2 = inlined_call_operand.vmem [shape: f32[2,4,256], index: 2, kind: output, shape index: {}]  }
   0x1 LB: > { %s374_s10 = sadd.s32 4294967295, %s347_s9   ;;  %p278_p0 = scmp.ge.s32.totalorder %s347_s9, 1  ;;  %s347_s9 = sphi %s368_s9, %s13_s9  }
   0x2   : > { %p91_p1 = scmp.lt.s32.totalorder %s347_s9, 3  ;;  %s104_s13 = sshll.u32 %s415_s0, 4  ;;  %s105_s13 = int_to_ptr.vmem [resolvable:$true] %s104_s13 }
   0x3   : > { %p302_p3 = scmp.eq.s32.totalorder %s374_s10, 0  ;;  %s322_s15 = scalar_lea.vmem %s105_s13, 16 }
   0x4   : > { %p381_p2 = pnand %p278_p0, %p91_p1  ;;  %p323_p6 = scmp.ne.s32.totalorder %s105_s13, %s322_s15 }
   0x5   : > { %p330_p10 = scmp.lt.s32.totalorder %s105_s13, %s105_s13  ;;  %p331_p11 = scmp.lt.s32.totalorder %s322_s15, %s322_s15 }
   0x6   : > { %p298_p4 = pneg %p381_p2 }
   0x7   : > { %p332_p12 = por %p331_p11, %p330_p10 }
   0x8   : > { %p299_p5 = pnand %p302_p3, %p298_p4 }
   0xa   : > { %p324_p7 = pneg %p299_p5 }
   0xc   : > { %p325_p8 = pnand %p324_p7, %p323_p6 }
   0xe   : > { %p326_p9 = pneg %p325_p8 }
  0x10   : > { %p333_p13 = pnand %p332_p12, %p326_p9 }
  0x12   : > { %336 = shalt.err (!%p333_p13)
}
  0x13   : > { %s349_s16 = smov [#allocation3]   ;;  %125 = sbr.rel (%p381_p2) target bundleno = 358 (0x166), region = 28 }
  0x14   : > { %301 = dma.vmem_to_smem (!%p299_p5), %s105_s13, 16, %s349_s16, [#allocation4]  }
  0x1a   : > { %342 = dma.done.wait (%p302_p3), [#allocation4], 16  }
  0x1b   : > { %344 = vsyncadd (%p302_p3), [#allocation4], 4294967280 }
  0x1c   : > { %131 = sfence }
  0x1d   : > { %p148_p0 = scmp.lt.s32.totalorder %s374_s10, 1  ;;  %vm169_vm0 = vcmask 7168   ;;  %vm172_vm1 = vcmask 3072   ;;  %v350_v0 = vmov 0.0   ;;  %vm162_vm2 = vcmask 1043456   ;;  %s175_s21 = sld [smem:[#allocation3]] }
  0x1e   : > { %170 = vst.msk [vmem:[#allocation2] sm:$0xff] %vm169_vm0, %v350_v0  ;;  %171 = vst.msk [vmem:[#allocation2 + $0x8] sm:$0xff] %vm169_vm0, %v350_v0  ;;  %v351_v6 = vmov 0   ;;  %s287_s22 = sld [smem:[#allocation3 + $0x1]]  ;;  %s288_s23 = sld [smem:[#allocation3 + $0x2]]  ;;  %v202_v26 = vlaneseq }
  0x1f   : > { %s420_s10 = smov (!%p148_p0, %s374_s10), 1  ;;  %316 = vset.pattern.permute.xlu0 %v351_v6  ;;  %v352_v24 = vmov 839922192  }
  0x20   : > { %s292_s17 = sshll.u32 %s420_s10, 3  ;;  %v200_v25 = vunpack.c.l.s4 %v352_v24  ;;  %v203_v28 = vshrl.u32 %v202_v26, 7 }
  0x21   : > { %s152_s20 = scalar_lea.vmem %s416_s1, %s292_s17  ;;  %s157_s26 = scalar_lea.vmem %s417_s2, %s292_s17 }
  0x22   : > { %v158_v1 = vld [vmem:[%s152_s20] sm:$0xff]  ;;  %v201_v27 = vunpack.c.0.s8 %v200_v25 }
  0x23   : > { %v160_v2 = vcombine.high %v158_v1, %v158_v1  ;;  %v163_v3 = vsel %vm162_vm2, %v158_v1, 0.0  ;;  %v177_v9 = vstv %s175_s21 }
  0x24   : > { %v181_v10 = vstv %s287_s22  ;;  %v186_v14 = vstv %s288_s23  ;;  %v204_v29 = vsub.s32 %v201_v27, %v203_v28 }
  0x25   : > { %v164_v4 = vsel %vm162_vm2, %v160_v2, 0.0 }
  0x26   : > { %v165_v5 = vadd.f32 %v164_v4, %v163_v3 }
  0x28   : > { %166 = vadd.xlane.f32.xlu0 %v165_v5 }
  0xb5   : > { %v167_v7 = vpop.xlane.xlu0 %166 }
  0xb6   : > { %v168_v8 = vmul.f32 0.00390625, %v167_v7 }
  0xb8   : > { %174 = vst.msk [vmem:[#allocation2 + $0x8] sm:$0xf] %vm172_vm1, %v168_v8 }
  0xbf   : > { %v176_v11 = vld [vmem:[#allocation2 + $0x7] sm:$0xf] }
  0xc0   : > { %v180_v12 = vld [vmem:[#allocation2 + $0x8] sm:$0xf]  ;;  %v178_v15 = vmul.f32 %v177_v9, %v176_v11 }
  0xc1   : > { %v185_v13 = vld [vmem:[#allocation2 + $0x9] sm:$0xf]  ;;  %v182_v16 = vmul.f32 %v181_v10, %v180_v12 }
  0xc2   : > { %v187_v18 = vmul.f32 %v186_v14, %v185_v13 }
  0xc3   : > { %v183_v17 = vadd.f32 %v182_v16, %v178_v15 }
  0xc5   : > { %v188_v19 = vadd.f32 %v187_v18, %v183_v17 }
  0xc7   : > { %v289_v20 = vmul.f32 -1.442695, %v188_v19 }
  0xc9   : > { %318 = vpow2.f32 %v289_v20 }
  0xd3   : > { %v319_v21 = vpop.eup %318 }
  0xd4   : > { %v192_v22 = vadd.f32 1.0, %v319_v21 }
  0xd6   : > { %320 = vrcp.f32 %v192_v22 }
  0xe0   : > { %v321_v23 = vpop.eup %320 }
  0xe1   : > { %197 = vperm.xlu0 %316, %v321_v23  }
 0x160   : > { %v198_v30 = vpop.permute.xlu0 %197 }
 0x161   : > { %v205_v31 = vrot.slane %v198_v30, %v204_v29 }
 0x163   : > { %v207_v32 = vmul.f32 %v205_v31, %v158_v1 }
 0x165   : > { %208 = vst [vmem:[%s157_s26] sm:$0xff] %v207_v32 }
 0x166 PF: > { %s13_s9 = sadd.s32 1, %s347_s9  }
 0x167   : > { %p10_p1 = scmp.ge.s32.totalorder %s13_s9, 4  }
 0x169   :  { %12 = sbr.rel (!%p10_p1) target bundleno = 1 (0x1), region = 63 }
 0x170   :  { %230 = vsyncpa [#allocation4], 1 }
 0x171   :  { %232 = vsyncpa [#allocation4 + $0x1], 1 }

</bundles_post_ra>
